<compile_context>
chip_gen: v6e
topology: v6e:2x2x1
jax: 0.10.0
libtpu: 0.0.40
codegen_flags: <defaults>
</compile_context>

<pallas_src>
import functools

import jax
import jax.numpy as jnp
from jax.experimental import pallas as pl
from jax.experimental.pallas import tpu as pltpu


# ----------------------------- Pallas kernel --------------------------------

def _deblock_kernel(xT_ref, pT_ref, lhat2T_ref, w_ref, b_ref, oT_ref, *, K):
    """One batch-block per grid step; node axis is always the lane (last) dim.

    xT_ref     : (TB*Cin, N_in)          input slab, row = b_local*Cin + c
    pT_ref     : (N_in, N_out)           up_transform^T (Pool matrix, dense)
    lhat2T_ref : (N_out, N_out)          (2 * L~)^T, factor 2 pre-folded
    w_ref      : (TB*Cout, K*TB*Cin)     fused per-batch block-diagonal ChebConv
                                         weights (k>=1 blocks pre-scaled by 0.5)
    b_ref      : (TB*Cout, 1)            bias, row = b_local*Cout + o
    oT_ref     : (TB*Cout, N_out)        output slab (lane-dense store)
    """
    xT = xT_ref[...]
    l2 = lhat2T_ref[...]

    # Pool (transposed): z^T = x^T @ P^T ; one MXU dot for the whole batch block.
    z = jnp.dot(xT, pT_ref[...], preferred_element_type=jnp.float32)   # (TB*Cin, N_out) f32

    # Chebyshev recursion on scaled terms u_0 = Tx_0, u_k = 2*Tx_k (k >= 1):
    #   u_1 = (2L~) z
    #   u_2 = (2L~) u_1 - 2*z          (single extra add, once)
    #   u_k = (2L~) u_{k-1} - u_{k-2}  (k >= 3, no per-order scaling)
    us = [z]
    if K > 1:
        u1 = jnp.dot(z.astype(l2.dtype), l2, preferred_element_type=jnp.float32)
        us.append(u1)
        u_pp, u_p = z, u1
        for k in range(2, K):
            u = jnp.dot(u_p.astype(l2.dtype), l2, preferred_element_type=jnp.float32)
            u = u - (z + z) if k == 2 else u - u_pp
            us.append(u)
            u_pp, u_p = u_p, u

    # Fused weight application: ONE matmul over the stacked (K*TB*Cin, N_out) slab.
    U = jnp.concatenate(us, axis=0).astype(w_ref.dtype)                 # (K*TB*Cin, N_out)
    acc = jnp.dot(w_ref[...], U, preferred_element_type=jnp.float32)    # (TB*Cout, N_out)

    acc = acc + b_ref[...]                       # bias broadcast over node lanes

    # ELU(alpha=1); clamp the exp argument so large positives never produce inf.
    oT_ref[...] = jnp.where(acc > 0.0, acc,
                            jnp.exp(jnp.minimum(acc, 0.0)) - 1.0).astype(oT_ref.dtype)


# ------------------------------ wrapper --------------------------------------

def deblock_forward(x, up_dense, lhat_dense, weight, bias, *,
                    batch_block=None, compute_dtype=jnp.bfloat16):
    """x: (B, N_in, Cin) -> (B, N_out, Cout).  Matches the PyTorch Deblock forward.

    batch_block: batch elements per grid step (default: all of B in one step).
                 On v7x pick batch_block = B // 2 (when B allows) so the "parallel"
                 grid axis has extent >= 2 and both TCs get work.  Requires
                 B % batch_block == 0; for batch_block < B keep batch_block*Cin and
                 batch_block*Cout multiples of 8 (sublane tiling).
    compute_dtype: MXU operand dtype (bf16 on v6e/v7x; accumulation is f32).
    """
    B, N_in, Cin = x.shape
    N_out = up_dense.shape[0]
    K, _, Cout = weight.shape
    TB = B if batch_block is None else batch_block
    assert B % TB == 0, "batch_block must divide B"
    NB = B // TB
    if NB > 1:
        assert (TB * Cin) % 8 == 0 and (TB * Cout) % 8 == 0, \
            "batch_block*Cin and batch_block*Cout must be multiples of 8 when tiling the batch"

    # ---------- layout plumbing (XLA side, outside the kernel) ----------
    # Input slab with nodes on lanes: row index = b*Cin + c.
    xT = jnp.transpose(x, (0, 2, 1)).reshape(B * Cin, N_in).astype(compute_dtype)
    pT = up_dense.T.astype(compute_dtype)                         # (N_in, N_out)
    lhat2T = (2.0 * lhat_dense).T.astype(compute_dtype)           # (N_out, N_out), 2*L~ folded

    # Fused, per-batch block-diagonal ChebConv weight.  Blocks k >= 1 are scaled by
    # 0.5 to absorb the u_k = 2*Tx_k scaling of the in-kernel recursion.
    scale = jnp.where(jnp.arange(K) == 0, 1.0, 0.5).astype(weight.dtype)
    w_scaled = weight * scale[:, None, None]                      # (K, Cin, Cout)
    w_big = jnp.einsum('bd,kco->bokdc', jnp.eye(TB, dtype=weight.dtype), w_scaled)
    w_big = w_big.reshape(TB * Cout, K * TB * Cin).astype(compute_dtype)

    # Bias as a column: row = b_local*Cout + o.
    bias_col = jnp.tile(bias.reshape(1, Cout), (TB, 1)).reshape(TB * Cout, 1)
    bias_col = bias_col.astype(jnp.float32)

    kernel = functools.partial(_deblock_kernel, K=K)
    outT = pl.pallas_call(
        kernel,
        out_shape=jax.ShapeDtypeStruct((B * Cout, N_out), jnp.float32),
        grid_spec=pltpu.PrefetchScalarGridSpec(
            num_scalar_prefetch=0,
            grid=(NB,),                                            # batch blocks
            in_specs=[
                pl.BlockSpec((TB * Cin, N_in), lambda i: (i, 0)),            # x slab
                pl.BlockSpec((N_in, N_out), lambda i: (0, 0)),               # P^T
                pl.BlockSpec((N_out, N_out), lambda i: (0, 0)),              # (2L~)^T
                pl.BlockSpec((TB * Cout, K * TB * Cin), lambda i: (0, 0)),   # fused W
                pl.BlockSpec((TB * Cout, 1), lambda i: (0, 0)),              # bias
            ],
            out_specs=pl.BlockSpec((TB * Cout, N_out), lambda i: (i, 0)),
        ),
        compiler_params=pltpu.CompilerParams(
            dimension_semantics=("parallel",)),
    )(xT, pT, lhat2T, w_big, bias_col)

    # Back to the module's (B, N_out, Cout) layout (wrapper-side transpose).
    return outT.reshape(B, Cout, N_out).transpose(0, 2, 1)


# ------------------------------ JAX glue -------------------------------------

def build_lhat(edge_index, num_nodes):
    """Dense scaled Laplacian used by ChebConv with lambda_max = 2.0 (default):
       L~ = (2/lambda_max) * (I - D^{-1/2} A D^{-1/2}) - I = -D^{-1/2} A D^{-1/2}
       (self loops removed before normalization, as in torch_geometric)."""
    row, col = edge_index
    A = jnp.zeros((num_nodes, num_nodes), jnp.float32).at[row, col].add(1.0)
    A = A * (1.0 - jnp.eye(num_nodes, dtype=jnp.float32))
    deg = A.sum(axis=1)
    dinv = jnp.where(deg > 0, 1.0 / jnp.sqrt(deg), 0.0)
    return -(dinv[:, None] * A * dinv[None, :])


def reference_deblock(x, up_dense, lhat_dense, weight, bias):
    """Pure-JAX f32 reference of the same forward pass (correctness check)."""
    P = jax.lax.Precision.HIGHEST
    K = weight.shape[0]
    z = jnp.einsum('oi,bic->boc', up_dense, x, precision=P)        # Pool
    tx0 = z
    out = jnp.einsum('boc,cd->bod', tx0, weight[0], precision=P)
    if K > 1:
        tx1 = jnp.einsum('on,bnc->boc', lhat_dense, z, precision=P)
        out = out + jnp.einsum('boc,cd->bod', tx1, weight[1], precision=P)
        for k in range(2, K):
            tx2 = 2.0 * jnp.einsum('on,bnc->boc', lhat_dense, tx1, precision=P) - tx0
            out = out + jnp.einsum('boc,cd->bod', tx2, weight[k], precision=P)
            tx0, tx1 = tx1, tx2
    out = out + bias[None, None, :]
    return jnp.where(out > 0, out, jnp.exp(out) - 1.0)             # ELU


# -------------------------------- main ----------------------------------------

if __name__ == "__main__":
    B, N_in, N_out = 2, 16, 32
    Cin, Cout, K = 4, 8, 3

    key = jax.random.PRNGKey(0)
    kx, kup, kw, kb = jax.random.split(key, 4)

    # Input node features (B, N_in, Cin)
    x = jax.random.normal(kx, (B, N_in, Cin), dtype=jnp.float32)

    # Deterministic sparse-like up_transform (N_out, N_in): 2 nonzeros per output node.
    vals = jax.random.uniform(kup, (N_out, 2), dtype=jnp.float32)
    rows = jnp.arange(N_out)
    up_dense = jnp.zeros((N_out, N_in), jnp.float32)
    up_dense = up_dense.at[rows, rows % N_in].add(vals[:, 0])
    up_dense = up_dense.at[rows, (rows + 1) % N_in].add(vals[:, 1])

    # Deterministic symmetric ring graph over the N_out (upsampled) nodes.
    src = jnp.arange(N_out)
    dst = (src + 1) % N_out
    edge_index = jnp.stack([jnp.concatenate([src, dst]),
                            jnp.concatenate([dst, src])], axis=0)
    lhat_dense = build_lhat(edge_index, N_out)

    # ChebConv parameters: xavier_uniform weights (K, Cin, Cout).
    bound = (6.0 / (Cin + Cout)) ** 0.5
    weight = jax.random.uniform(kw, (K, Cin, Cout), dtype=jnp.float32,
                                minval=-bound, maxval=bound)
    # Module init is zeros; use a small nonzero bias to exercise the bias path.
    bias = 0.1 * jax.random.normal(kb, (Cout,), dtype=jnp.float32)

    ref = reference_deblock(x, up_dense, lhat_dense, weight, bias)

    # Structural correctness: same kernel with f32 operands.
    out_f32 = deblock_forward(x, up_dense, lhat_dense, weight, bias,
                              compute_dtype=jnp.float32)
    out_f32 = jax.block_until_ready(out_f32)
    assert out_f32.shape == (B, N_out, Cout)
    assert jnp.allclose(out_f32, ref, atol=3e-2, rtol=3e-2), "f32 kernel mismatch"

    # Performance configuration: bf16 MXU operands, f32 accumulation.
    out = deblock_forward(x, up_dense, lhat_dense, weight, bias)
    out = jax.block_until_ready(out)
    assert out.shape == (B, N_out, Cout)
    err = jnp.max(jnp.abs(out - ref))
    assert err <= 6e-2 * jnp.maximum(1.0, jnp.max(jnp.abs(ref))), "bf16 kernel mismatch"

    print("KERNEL_OK")
</pallas_src>

<mosaic_0001>
module attributes {stable_mosaic.version = 11 : i64} {
  func.func @_deblock_kernel(%arg0: i32, %arg1: memref<8x16xf32, #tpu.memory_space<vmem>>, %arg2: memref<16x32xf32, #tpu.memory_space<vmem>>, %arg3: memref<32x32xf32, #tpu.memory_space<vmem>>, %arg4: memref<16x24xf32, #tpu.memory_space<vmem>>, %arg5: memref<16x1xf32, #tpu.memory_space<vmem>>, %arg6: memref<16x32xf32, #tpu.memory_space<vmem>>) attributes {dimension_semantics = [#tpu.dimension_semantics<parallel>], iteration_bounds = array<i64: 1>, scalar_prefetch = 0 : i64, scratch_operands = 0 : i64, tpu.core_type = #tpu.core_type<tc>, window_params = [{transform_indices = @transform_0, window_bounds = array<i64: 8, 16>}, {pipeline_mode = #tpu.pipeline_mode<synchronous>, transform_indices = @transform_1, window_bounds = array<i64: 16, 32>}, {pipeline_mode = #tpu.pipeline_mode<synchronous>, transform_indices = @transform_2, window_bounds = array<i64: 32, 32>}, {pipeline_mode = #tpu.pipeline_mode<synchronous>, transform_indices = @transform_3, window_bounds = array<i64: 16, 24>}, {pipeline_mode = #tpu.pipeline_mode<synchronous>, transform_indices = @transform_4, window_bounds = array<i64: 16, 1>}, {transform_indices = @transform_5, window_bounds = array<i64: 16, 32>}]} {
    %c0 = arith.constant 0 : index
    %c0_0 = arith.constant 0 : index
    %0 = vector.load %arg1[%c0, %c0_0] : memref<8x16xf32, #tpu.memory_space<vmem>>, vector<8x16xf32>
    %c0_1 = arith.constant 0 : index
    %c0_2 = arith.constant 0 : index
    %1 = vector.load %arg3[%c0_1, %c0_2] : memref<32x32xf32, #tpu.memory_space<vmem>>, vector<32x32xf32>
    %c0_3 = arith.constant 0 : index
    %c0_4 = arith.constant 0 : index
    %2 = vector.load %arg2[%c0_3, %c0_4] : memref<16x32xf32, #tpu.memory_space<vmem>>, vector<16x32xf32>
    %cst = arith.constant dense<0.000000e+00> : vector<8x32xf32>
    %3 = tpu.matmul %0, %2, %cst {dimension_numbers = #tpu.dot_dimension_numbers<[1], [0], [0], [1], [0, 0, 1, 1], [], []>} : vector<8x16xf32>, vector<16x32xf32>, vector<8x32xf32> -> vector<8x32xf32>
    %cst_5 = arith.constant dense<0.000000e+00> : vector<8x32xf32>
    %4 = tpu.matmul %3, %1, %cst_5 {dimension_numbers = #tpu.dot_dimension_numbers<[1], [0], [0], [1], [0, 0, 1, 1], [], []>} : vector<8x32xf32>, vector<32x32xf32>, vector<8x32xf32> -> vector<8x32xf32>
    %cst_6 = arith.constant dense<0.000000e+00> : vector<8x32xf32>
    %5 = tpu.matmul %4, %1, %cst_6 {dimension_numbers = #tpu.dot_dimension_numbers<[1], [0], [0], [1], [0, 0, 1, 1], [], []>} : vector<8x32xf32>, vector<32x32xf32>, vector<8x32xf32> -> vector<8x32xf32>
    %6 = arith.addf %3, %3 : vector<8x32xf32>
    %7 = arith.subf %5, %6 : vector<8x32xf32>
    %8 = tpu.concatenate %3, %4, %7 in 0 : vector<8x32xf32>, vector<8x32xf32>, vector<8x32xf32> -> vector<24x32xf32>
    %c0_7 = arith.constant 0 : index
    %c0_8 = arith.constant 0 : index
    %9 = vector.load %arg4[%c0_7, %c0_8] : memref<16x24xf32, #tpu.memory_space<vmem>>, vector<16x24xf32>
    %cst_9 = arith.constant dense<0.000000e+00> : vector<16x32xf32>
    %10 = tpu.matmul %9, %8, %cst_9 {dimension_numbers = #tpu.dot_dimension_numbers<[1], [0], [0], [1], [0, 0, 1, 1], [], []>} : vector<16x24xf32>, vector<24x32xf32>, vector<16x32xf32> -> vector<16x32xf32>
    %c0_10 = arith.constant 0 : index
    %c0_11 = arith.constant 0 : index
    %11 = vector.load %arg5[%c0_10, %c0_11] : memref<16x1xf32, #tpu.memory_space<vmem>>, vector<16x1xf32>
    %12 = vector.broadcast %11 : vector<16x1xf32> to vector<16x32xf32>
    %13 = arith.addf %10, %12 : vector<16x32xf32>
    %cst_12 = arith.constant 0.000000e+00 : f32
    %14 = vector.broadcast %cst_12 : f32 to vector<16x32xf32>
    %15 = arith.cmpf ogt, %13, %14 : vector<16x32xf32>
    %cst_13 = arith.constant 0.000000e+00 : f32
    %16 = vector.broadcast %cst_13 : f32 to vector<16x32xf32>
    %17 = arith.minimumf %13, %16 : vector<16x32xf32>
    %18 = math.exp %17 : vector<16x32xf32>
    %cst_14 = arith.constant 1.000000e+00 : f32
    %19 = vector.broadcast %cst_14 : f32 to vector<16x32xf32>
    %20 = arith.subf %18, %19 : vector<16x32xf32>
    %21 = arith.select %15, %13, %20 : vector<16x32xi1>, vector<16x32xf32>
    %c0_15 = arith.constant 0 : index
    %c0_16 = arith.constant 0 : index
    %22 = vector.load %arg6[%c0_15, %c0_16] : memref<16x32xf32, #tpu.memory_space<vmem>>, vector<16x32xf32>
    tpu.vector_store %arg6[%c0_15, %c0_16], %21 {strides = array<i32>} : memref<16x32xf32, #tpu.memory_space<vmem>>, vector<16x32xf32>,
    return
  }
  func.func @transform_0(%arg0: i32) -> (i32, i32) {
    %c0_i32 = arith.constant 0 : i32
    %c0_i32_0 = arith.constant 0 : i32
    return %arg0, %c0_i32 : i32, i32
  }
  func.func @transform_1(%arg0: i32) -> (i32, i32) {
    %c0_i32 = arith.constant 0 : i32
    %c0_i32_0 = arith.constant 0 : i32
    %c0_i32_1 = arith.constant 0 : i32
    return %c0_i32, %c0_i32_0 : i32, i32
  }
  func.func @transform_2(%arg0: i32) -> (i32, i32) {
    %c0_i32 = arith.constant 0 : i32
    %c0_i32_0 = arith.constant 0 : i32
    %c0_i32_1 = arith.constant 0 : i32
    return %c0_i32, %c0_i32_0 : i32, i32
  }
  func.func @transform_3(%arg0: i32) -> (i32, i32) {
    %c0_i32 = arith.constant 0 : i32
    %c0_i32_0 = arith.constant 0 : i32
    %c0_i32_1 = arith.constant 0 : i32
    return %c0_i32, %c0_i32_0 : i32, i32
  }
  func.func @transform_4(%arg0: i32) -> (i32, i32) {
    %c0_i32 = arith.constant 0 : i32
    %c0_i32_0 = arith.constant 0 : i32
    %c0_i32_1 = arith.constant 0 : i32
    return %c0_i32, %c0_i32_0 : i32, i32
  }
  func.func @transform_5(%arg0: i32) -> (i32, i32) {
    %c0_i32 = arith.constant 0 : i32
    %c0_i32_0 = arith.constant 0 : i32
    return %arg0, %c0_i32 : i32, i32
  }
}

</mosaic_0001>

<bundles_post_ra>
// kernel: tpu_custom_call.1
= control target key start
LH: loop header
LB: loop body
LE: loop exit
PB: predicated region body
PF: predicated region fallthrough
CT: control target
= control target key end

     0   :  { %10 = vsyncpa [#allocation3], 0  ;;  %s662_s0 = inlined_call_operand.hbm [shape: f32[8,16], index: 0, kind: input, shape index: {}]   ;;  %s663_s1 = inlined_call_operand.vmem [shape: f32[16,32], index: 1, kind: input, shape index: {}]   ;;  %s664_s2 = inlined_call_operand.hbm [shape: f32[32,32], index: 2, kind: input, shape index: {}]   ;;  %s665_s3 = inlined_call_operand.hbm [shape: f32[16,24], index: 3, kind: input, shape index: {}]   ;;  %s666_s4 = inlined_call_operand.vmem [shape: f32[16,1], index: 4, kind: input, shape index: {}]   ;;  %s667_s5 = inlined_call_operand.hbm [shape: f32[16,32], index: 5, kind: output, shape index: {}]  }
   0x1   :  { %11 = vsyncpa [#allocation6], 0 }
   0x2   :  { %12 = vsyncpa [#allocation4], 0  ;;  %s581_s18 = smov [#allocation5]  }
   0x3   :  { %s30_s19 = sshll.u32 %s581_s18, 4  ;;  %s31_s19 = int_to_ptr.vmem [resolvable:$true] %s30_s19 }
   0x4   :  { %s503_s20 = scalar_lea.vmem %s31_s19, 512  ;;  %p508_p1 = scmp.lt.s32.totalorder %s31_s19, %s31_s19 }
   0x5   :  { %p504_p0 = scmp.ne.s32.totalorder %s31_s19, %s503_s20  ;;  %p509_p2 = scmp.lt.s32.totalorder %s503_s20, %s503_s20 }
   0x7   :  { %p510_p3 = por %p509_p2, %p508_p1 }
   0x9   :  { %p511_p4 = pnand %p510_p3, %p504_p0 }
   0xb   :  { %514 = shalt.err (!%p511_p4)
}
   0xc   :  { %s582_s21 = smov 128   ;;  %s583_s22 = smov 8  }
   0xd   :  { %36 = dma.hbm_to_vmem [thread:$0]  %s664_s2, 512, %s31_s19, [#allocation6], %s582_s21, %s582_s21, %s583_s22  }
   0xe   :  { %s584_s25 = smov [#allocation2]   ;;  %s585_s27 = smov [#allocation7]  }
   0xf   :  { %s19_s26 = sshll.u32 %s584_s25, 4  ;;  %s42_s28 = sshll.u32 %s585_s27, 4  ;;  %s20_s26 = int_to_ptr.vmem [resolvable:$true] %s19_s26  ;;  %s43_s28 = int_to_ptr.vmem [resolvable:$true] %s42_s28 }
  0x10   :  { %s523_s29 = scalar_lea.vmem %s20_s26, 128  ;;  %p528_p6 = scmp.lt.s32.totalorder %s20_s26, %s20_s26 }
  0x11   :  { %p524_p5 = scmp.ne.s32.totalorder %s20_s26, %s523_s29  ;;  %p529_p7 = scmp.lt.s32.totalorder %s523_s29, %s523_s29 }
  0x13   :  { %p530_p8 = por %p529_p7, %p528_p6 }
  0x15   :  { %p531_p9 = pnand %p530_p8, %p524_p5 }
  0x17   :  { %534 = shalt.err (!%p531_p9)
}
  0x18   :  { %22 = dma.hbm_to_vmem [thread:$0]  %s662_s0, 128, %s20_s26, [#allocation3]  }
  0x19   :  { %s543_s7 = scalar_lea.vmem %s43_s28, 256  ;;  %p548_p11 = scmp.lt.s32.totalorder %s43_s28, %s43_s28 }
  0x1a   :  { %p544_p10 = scmp.ne.s32.totalorder %s43_s28, %s543_s7  ;;  %p549_p12 = scmp.lt.s32.totalorder %s543_s7, %s543_s7 }
  0x1c   :  { %p550_p13 = por %p549_p12, %p548_p11 }
  0x1e   :  { %p551_p0 = pnand %p550_p13, %p544_p10 }
  0x20   :  { %554 = shalt.err (!%p551_p0)
}
  0x21   :  { %48 = dma.hbm_to_vmem [thread:$0]  %s665_s3, 256, %s43_s28, [#allocation6], %s582_s21, %s582_s21, %s583_s22  }
  0x22   :  { %575 = dma.done.wait [#allocation3], 128  }
  0x23   :  { %576 = vsyncadd [#allocation3], 4294967168 }
  0x24   :  { %577 = dma.done.wait [#allocation6], 768  }
  0x25   :  { %578 = vsyncadd [#allocation6], 4294966528  ;;  %v586_v0 = vmov 0.0   ;;  %vm587_vm0 = vmmov 0   ;;  %v66_v1 = vld [vmem:[%s663_s1 + $0x8] sm:$0xff]  ;;  %v65_v2 = vld [vmem:[%s663_s1] sm:$0xff] }
  0x26   :  { %443 = vmatprep.subr.mxu0 %v586_v0  ;;  %447 = vmatprep.mubr.msk.f32.mxu0 %vm587_vm0, %v586_v0  ;;  %v60_v3 = vld [vmem:[#allocation2] sm:$0xff]  ;;  %vm67_vm1 = vcmask 130048   ;;  %v63_v5 = vld [vmem:[#allocation5 + $0x10] sm:$0xff]  ;;  %v62_v6 = vld [vmem:[#allocation5 + $0x8] sm:$0xff]  ;;  %vm141_vm2 = vcmask 261120   ;;  %vm304_vm3 = vcmask 195584  }
  0x27   :  { %450 = vmatprep.subr.mxu1 %v586_v0  ;;  %458 = vmatprep.mubr.msk.f32.mxu1 %vm587_vm0, %v586_v0  ;;  %v64_v4 = vld [vmem:[#allocation5 + $0x18] sm:$0xff]  ;;  %v61_v7 = vld [vmem:[#allocation5] sm:$0xff]  ;;  %v588_v14 = vmov 0   ;;  %v291_v20 = vld [vmem:[#allocation7 + $0x8] sm:$0xff] }
  0x28   :  { %444 = vmatpush3.msra.mxu0 %v66_v1  ;;  %451 = vmatpush3.msra.mxu1 %v64_v4  ;;  %v290_v12 = vld [vmem:[#allocation7] sm:$0xff]  ;;  %v292_v13 = vld [vmem:[%s666_s4] sm:$0xff] }
  0x29   :  { %445 = vmatprep.subr.mxu0 %v586_v0  ;;  %452 = vmatprep.subr.mxu1 %v586_v0  ;;  %v293_v15 = vld [vmem:[%s666_s4 + $0x8] sm:$0xff]  ;;  %s589_s4 = smov [#allocation8]  }
  0x2a   :  { %446 = vmatpush3.msra.mxu0 %v65_v2  ;;  %453 = vmatpush3.msra.mxu1 %v63_v5  ;;  %s405_s14 = sshll.u32 %s589_s4, 4  ;;  %s406_s14 = int_to_ptr.vmem [resolvable:$true] %s405_s14 }
  0x2b   :  { %448 = vmatmul.mubr.msk.f32.vlgmr.msra.gmra.mxu0 %vm67_vm1, %v60_v3  ;;  %454 = vmatprep.subr.mxu1 %v586_v0  ;;  %s555_s15 = scalar_lea.vmem %s406_s14, 256  ;;  %p560_p2 = scmp.lt.s32.totalorder %s406_s14, %s406_s14 }
  0x2c   :  { %461 = vmatprep.subr.mxu0 %v586_v0  ;;  %455 = vmatpush3.msra.mxu1 %v62_v6  ;;  %p556_p1 = scmp.ne.s32.totalorder %s406_s14, %s555_s15  ;;  %p561_p3 = scmp.lt.s32.totalorder %s555_s15, %s555_s15 }
  0x2d   :  { %462 = vmatpush3.msra.mxu0 %v64_v4  ;;  %456 = vmatprep.subr.mxu1 %v586_v0 }
  0x2e   :  { %463 = vmatprep.subr.mxu0 %v586_v0  ;;  %469 = vmatprep.mubr.msk.f32.mxu0 %vm587_vm0, %v586_v0  ;;  %p562_p4 = por %p561_p3, %p560_p2 }
  0x2f   :  { %464 = vmatpush3.msra.mxu0 %v63_v5  ;;  %457 = vmatpush3.msra.mxu1 %v61_v7 }
  0x30   :  { %465 = vmatprep.subr.mxu0 %v586_v0  ;;  %490 = vset.pattern.permute.xlu0 %v588_v14  ;;  %p563_p5 = pnand %p562_p4, %p556_p1 }
  0x31   :  { %466 = vmatpush3.msra.mxu0 %v62_v6  ;;  %296 = vperm.xlu0 %490, %v292_v13  }
  0x32   :  { %467 = vmatprep.subr.mxu0 %v586_v0 }
  0x33   :  { %468 = vmatpush3.msra.mxu0 %v61_v7 }
  0x35   :  { %301 = vperm.xlu0 %490, %v293_v15  }
  0xac   :  { %v297_v21 = vpop.permute.xlu0 %296 }
  0xb0   :  { %v302_v22 = vpop.permute.xlu0 %301 }
  0xeb   :  { %v137_v8 = vpop.f32.mrf.mxu0 }
  0xec   :  { %459 = vmatmul.mubr.msk.f32.vlgmr.msra.gmra.mxu1 %vm141_vm2, %v137_v8  ;;  %v288_v16 = vadd.f32 %v137_v8, %v137_v8 }
  0xed   :  { %v449_v9 = vpop.f32.mrf.mxu0  ;;  %478 = vmatprep.mubr.msk.f32.mxu1 %vm304_vm3, %v290_v12 }
 0x1ac   :  { %v211_v10 = vpop.f32.mrf.mxu1 }
 0x1ad   :  { %470 = vmatmul.mubr.msk.f32.vlgmr.msra.gmra.mxu0 %vm141_vm2, %v211_v10 }
 0x1ae   :  { %v460_v11 = vpop.f32.mrf.mxu1 }
 0x26d   :  { %v284_v17 = vpop.f32.mrf.mxu0 }
 0x26e   :  { %v289_v18 = vsub.f32 %v284_v17, %v288_v16 }
 0x26f   :  { %v471_v19 = vpop.f32.mrf.mxu0 }
 0x270   :  { %472 = vmatprep.subr.mxu1 %v289_v18 }
 0x271   :  { %473 = vmatpush3.msra.mxu1 %v289_v18 }
 0x272   :  { %474 = vmatprep.subr.mxu1 %v211_v10 }
 0x273   :  { %475 = vmatpush3.msra.mxu1 %v211_v10 }
 0x274   :  { %476 = vmatprep.subr.mxu1 %v137_v8 }
 0x275   :  { %477 = vmatpush3.msra.mxu1 %v137_v8 }
 0x276   :  { %479 = vmatmul.mubr.msk.f32.vlgmr.msra.gmra.mxu1 %vm304_vm3, %v291_v20 }
 0x336   :  { %v480_v23 = vpop.f32.mrf.mxu1 }
 0x337   :  { %v383_v24 = vadd.f32 %v480_v23, %v302_v22 }
 0x338   :  { %v377_v25 = vpop.f32.mrf.mxu1 }
 0x339   :  { %v389_v26 = vmin.f32 %v383_v24, 0.0  ;;  %v378_v27 = vadd.f32 %v377_v25, %v297_v21  ;;  %vm387_vm4 = vcmp.gt.f32.partialorder %v383_v24, 0.0 }
 0x33b   :  { %v392_v28 = vmul.f32 1.442695, %v389_v26  ;;  %v388_v29 = vmin.f32 %v378_v27, 0.0  ;;  %vm386_vm5 = vcmp.gt.f32.partialorder %v378_v27, 0.0 }
 0x33d   :  { %491 = vpow2.f32 %v392_v28  ;;  %v390_v30 = vmul.f32 1.442695, %v388_v29 }
 0x33f   :  { %493 = vpow2.f32 %v390_v30 }
 0x34a   :  { %v492_v31 = vpop.eup %491 }
 0x34b   :  { %v424_v32 = vadd.f32 -1.0, %v492_v31 }
 0x34c   :  { %v494_v33 = vpop.eup %493 }
 0x34d   :  { %v397_v34 = vsel %vm387_vm4, %v383_v24, %v424_v32  ;;  %v423_v35 = vadd.f32 -1.0, %v494_v33 }
 0x34e   :  { %399 = vst.msk [vmem:[#allocation8 + $0x8] sm:$0xff] %vm141_vm2, %v397_v34 }
 0x34f   :  { %v396_v36 = vsel %vm386_vm5, %v378_v27, %v423_v35 }
 0x350   :  { %398 = vst.msk [vmem:[#allocation8] sm:$0xff] %vm141_vm2, %v396_v36 }
 0x351   :  { %566 = shalt.err (!%p563_p5)
}
 0x352   :  { %411 = dma.vmem_to_hbm [thread:$0]  %s406_s14, 256, %s667_s5, [#allocation4], %s582_s21, %s582_s21, %s583_s22  }
 0x353   :  { %579 = dma.done.wait [#allocation4], 256  }
 0x354   :  { %580 = vsyncadd [#allocation4], 4294967040 }
 0x355   :  { %415 = vsyncpa [#allocation3], 1 }
 0x356   :  { %416 = vsyncpa [#allocation6], 1 }
 0x357   :  { %417 = vsyncpa [#allocation4], 1 }

</bundles_post_ra>
